<compile_context>
chip_gen: v6e
topology: v6e:2x2x1
jax: 0.10.0
libtpu: 0.0.40
codegen_flags: <defaults>
</compile_context>

<pallas_src>
import functools

import jax
import jax.numpy as jnp
from jax import lax
from jax.experimental import pallas as pl
from jax.experimental.pallas import tpu as pltpu


# ----------------------------------------------------------------------------
# helpers
# ----------------------------------------------------------------------------
def _round_up(x, m):
    return ((x + m - 1) // m) * m


def _row_normalize(x, eps=1e-12):
    return x / jnp.maximum(jnp.sqrt(jnp.sum(x * x, axis=1, keepdims=True)), eps)


def _vmem_limit_bytes():
    """Chip-keyed scoped-VMEM limit: 3/4 of physical capacity, capped at 112 MiB."""
    try:
        cap = int(pltpu.get_tpu_info().vmem_capacity_bytes)
    except Exception:
        cap = 64 << 20          # conservative default (v7x per-TC VMEM)
    return int(min(cap * 3 // 4, 112 << 20))


def _resident_spec(shape, index_map):
    """BlockSpec for a constant-index_map (never re-fetched) input: single pipeline buffer."""
    try:
        return pl.BlockSpec(shape, index_map, pipeline_mode=pl.Buffered(1))
    except Exception:           # pipeline_mode / Buffered unavailable on this jax version
        return pl.BlockSpec(shape, index_map)


def _pick_block_rows(va, vc_pad, k, mask_bytes, vmem_limit):
    """Anchor-row tile size derived from the real VMEM budget.

    Accounts for: resident bf16 contrast^T (single buffer), double-buffered anchor (f32) and mask
    tiles, and ~8 full-width (TR, Vc_pad) f32 temporaries (mask upcast, pos, logits, shifted
    logits, exp, select, log_prob, product).
    """
    ct_bytes = k * vc_pad * 2                               # resident bf16 contrast^T
    budget = max(vmem_limit - ct_bytes - (8 << 20), 2 << 20)
    per_row = vc_pad * (2 * mask_bytes + 8 * 4) + 2 * k * 4
    rows = budget // per_row
    half = _round_up(max((va + 1) // 2, 8), 8)              # keep >= 2 grid blocks (megacore)
    rows = int(min(rows, half, 2048))
    rows = max(rows, 8)
    if rows >= 256:
        rows = (rows // 256) * 256                          # MXU-height aligned tiles
    else:
        rows = (rows // 8) * 8
    return rows


# ----------------------------------------------------------------------------
# Pallas kernel: one anchor-row block of MutualInfo -> per-block partial loss
# ----------------------------------------------------------------------------
def _mutual_info_kernel(a_ref, ct_ref, mask_ref, o_ref, *, temperature):
    a = a_ref[...]                                          # (TR, K) f32
    m = mask_ref[...].astype(jnp.float32)                   # (TR, Vc_pad); padding == -1 sentinel
    pos = jnp.maximum(m, 0.0)                               # positive-pair weights (counts)

    # F.normalize(anchor, dim=1) with 1/temperature folded into the scale (rsqrt -> EUP slot).
    ss = jnp.sum(a * a, axis=1, keepdims=True)
    inv = lax.rsqrt(jnp.maximum(ss, 1e-24))
    a_scaled = (a * (inv * (1.0 / temperature))).astype(jnp.bfloat16)

    # (TR, K) @ (K, Vc_pad) on the MXU in bf16 with f32 accumulation.
    logits = jnp.dot(a_scaled, ct_ref[...], preferred_element_type=jnp.float32)

    # Padded contrast columns produce logits == 0 — a perfectly valid per-row stability shift.
    row_max = jnp.max(logits, axis=1, keepdims=True)
    l = logits - row_max
    e = jnp.exp(l)                                          # single exp plane, reused below
    # negative pairs are exactly count == 0; padded columns (sentinel -1) self-exclude.
    sum_exp = jnp.sum(jnp.where(m == 0.0, e, 0.0), axis=1, keepdims=True)
    log_prob = l - jnp.log(sum_exp + e + 1e-10)

    partial = -jnp.sum(pos * log_prob)                      # padded rows/cols contribute exactly 0
    o_ref[...] = jnp.full(o_ref.shape, partial, dtype=jnp.float32)


def mutual_info(anchor, contrast, pos_mask_pad, temperature, *,
                block_rows, va_pad, vc_pad, vmem_limit):
    """One MutualInfo direction. pos_mask_pad is padded with the -1 sentinel to (va_pad, vc_pad)."""
    va, k = anchor.shape
    vc = contrast.shape[0]

    # Layout plumbing (once per call): normalize, transpose, zero-pad, bf16-cast the contrast.
    c = contrast.astype(jnp.float32)
    c_inv = lax.rsqrt(jnp.maximum(jnp.sum(c * c, axis=1, keepdims=True), 1e-24))
    ct = jnp.pad((c * c_inv).T, ((0, 0), (0, vc_pad - vc))).astype(jnp.bfloat16)   # (K, Vc_pad)
    a = jnp.pad(anchor.astype(jnp.float32), ((0, va_pad - va), (0, 0)))            # (Va_pad, K)

    num_blocks = va_pad // block_rows
    kernel = functools.partial(_mutual_info_kernel, temperature=float(temperature))

    out = pl.pallas_call(
        kernel,
        grid=(num_blocks,),
        in_specs=[
            pl.BlockSpec((block_rows, k), lambda i: (i, 0)),        # anchor row tile
            _resident_spec((k, vc_pad), lambda i: (0, 0)),          # resident bf16 contrast^T
            pl.BlockSpec((block_rows, vc_pad), lambda i: (i, 0)),   # mask row tile
        ],
        out_specs=pl.BlockSpec((1, 8, 128), lambda i: (i, 0, 0)),   # lane-dense partial per block
        out_shape=jax.ShapeDtypeStruct((num_blocks, 8, 128), jnp.float32),
        compiler_params=pltpu.CompilerParams(
            dimension_semantics=("parallel",),
            vmem_limit_bytes=int(vmem_limit),
        ),
    )(a, ct, pos_mask_pad)

    return jnp.sum(out[:, 0, 0])


# ----------------------------------------------------------------------------
# TAMI module (mask precomputation = __init__ glue, plain JAX)
# ----------------------------------------------------------------------------
def build_cvl_mask(embeddings, pos_threshold):
    norm_embed = _row_normalize(embeddings)
    cos_sim = norm_embed @ norm_embed.T
    return (cos_sim >= pos_threshold).astype(jnp.float32)


class TAMI:
    def __init__(self, temperature, weight_MI, pos_threshold,
                 trans_e2c, pretrain_word_embeddings_en, pretrain_word_embeddings_cn):
        self.temperature = float(temperature)
        self.weight_MI = float(weight_MI)
        self.pos_threshold = float(pos_threshold)
        self.vmem_limit = _vmem_limit_bytes()

        trans_e2c = jnp.asarray(trans_e2c, jnp.float32)
        trans_c2e = trans_e2c.T

        pos_mono_en = build_cvl_mask(
            jnp.asarray(pretrain_word_embeddings_en, jnp.float32), self.pos_threshold)
        pos_mono_cn = build_cvl_mask(
            jnp.asarray(pretrain_word_embeddings_cn, jnp.float32), self.pos_threshold)

        # Translation masks: entries are integer COUNTS used as multiplicative weights.
        self.pos_trans_mask_en = pos_mono_en @ trans_e2c      # (V_EN, V_CN)
        self.pos_trans_mask_cn = pos_mono_cn @ trans_c2e      # (V_CN, V_EN)

        # Denominator precomputed once (padding does not change it: sentinel columns get relu'd).
        self.mask_sum = jnp.sum(self.pos_trans_mask_en) + jnp.sum(self.pos_trans_mask_cn)

        # bf16 storage is exact for integer counts <= 256; otherwise keep f32 (semantics first).
        max_count = float(jnp.maximum(jnp.max(self.pos_trans_mask_en),
                                      jnp.max(self.pos_trans_mask_cn)))
        self._mask_dtype = jnp.bfloat16 if max_count <= 256.0 else jnp.float32
        self._prepared_k = None

    def _prepare(self, k):
        """Feature-dim-dependent tiling + mask padding (built once, cached)."""
        if self._prepared_k == k:
            return
        self._prepared_k = k
        mask_bytes = jnp.dtype(self._mask_dtype).itemsize
        v_en, v_cn = self.pos_trans_mask_en.shape

        # en -> cn direction: anchor rows = V_EN, contrast columns = V_CN
        self.vc_pad_en = _round_up(v_cn, 128)
        self.block_rows_en = _pick_block_rows(v_en, self.vc_pad_en, k, mask_bytes, self.vmem_limit)
        self.va_pad_en = _round_up(v_en, self.block_rows_en)
        self._pos_mask_en_pad = jnp.pad(
            self.pos_trans_mask_en,
            ((0, self.va_pad_en - v_en), (0, self.vc_pad_en - v_cn)),
            constant_values=-1.0).astype(self._mask_dtype)

        # cn -> en direction
        self.vc_pad_cn = _round_up(v_en, 128)
        self.block_rows_cn = _pick_block_rows(v_cn, self.vc_pad_cn, k, mask_bytes, self.vmem_limit)
        self.va_pad_cn = _round_up(v_cn, self.block_rows_cn)
        self._pos_mask_cn_pad = jnp.pad(
            self.pos_trans_mask_cn,
            ((0, self.va_pad_cn - v_cn), (0, self.vc_pad_cn - v_en)),
            constant_values=-1.0).astype(self._mask_dtype)

    def __call__(self, fea_en, fea_cn):
        self._prepare(int(fea_en.shape[1]))
        loss = mutual_info(fea_en, fea_cn, self._pos_mask_en_pad, self.temperature,
                           block_rows=self.block_rows_en, va_pad=self.va_pad_en,
                           vc_pad=self.vc_pad_en, vmem_limit=self.vmem_limit)
        loss = loss + mutual_info(fea_cn, fea_en, self._pos_mask_cn_pad, self.temperature,
                                  block_rows=self.block_rows_cn, va_pad=self.va_pad_cn,
                                  vc_pad=self.vc_pad_cn, vmem_limit=self.vmem_limit)
        return self.weight_MI * loss / self.mask_sum


# ----------------------------------------------------------------------------
# Pure-JAX reference (sanity check)
# ----------------------------------------------------------------------------
def _mutual_info_ref(anchor, contrast, mask, temperature):
    a = _row_normalize(anchor)
    c = _row_normalize(contrast)
    neg_mask = (mask <= 0).astype(jnp.float32)
    logits = (a @ c.T) / temperature
    logits = logits - jnp.max(logits, axis=1, keepdims=True)
    exp_logits = jnp.exp(logits) * neg_mask
    sum_exp = jnp.sum(exp_logits, axis=1, keepdims=True)
    log_prob = logits - jnp.log(sum_exp + jnp.exp(logits) + 1e-10)
    return -jnp.sum(mask * log_prob)


if __name__ == "__main__":
    key = jax.random.PRNGKey(0)
    k1, k2, k3, k4, k5 = jax.random.split(key, 5)

    V_EN, V_CN = 32, 24   # vocab sizes
    EMB = 16              # pretrained word-embedding dim
    K = 16                # feature dim (e.g. num topics)

    pretrain_emb_en = jax.random.normal(k1, (V_EN, EMB), jnp.float32)
    pretrain_emb_cn = jax.random.normal(k2, (V_CN, EMB), jnp.float32)
    trans_e2c = (jax.random.uniform(k3, (V_EN, V_CN)) < 0.1).astype(jnp.float32)

    fea_en = jax.random.normal(k4, (V_EN, K), jnp.float32)
    fea_cn = jax.random.normal(k5, (V_CN, K), jnp.float32)

    model = TAMI(temperature=0.2, weight_MI=50.0, pos_threshold=0.4,
                 trans_e2c=trans_e2c,
                 pretrain_word_embeddings_en=pretrain_emb_en,
                 pretrain_word_embeddings_cn=pretrain_emb_cn)

    loss = model(fea_en, fea_cn)
    jax.block_until_ready(loss)

    # reference check (bf16 MXU inputs => loosened tolerance vs the f32 reference)
    ref = _mutual_info_ref(fea_en, fea_cn, model.pos_trans_mask_en, model.temperature)
    ref = ref + _mutual_info_ref(fea_cn, fea_en, model.pos_trans_mask_cn, model.temperature)
    ref = model.weight_MI * ref / model.mask_sum
    assert jnp.allclose(loss, ref, rtol=3e-2, atol=3e-2), (loss, ref)

    print("KERNEL_OK")
</pallas_src>

<mosaic_0001>
module attributes {stable_mosaic.version = 11 : i64} {
  func.func @_mutual_info_kernel(%arg0: i32, %arg1: memref<16x16xf32, #tpu.memory_space<vmem>>, %arg2: memref<16x128xbf16, #tpu.memory_space<vmem>>, %arg3: memref<16x128xbf16, #tpu.memory_space<vmem>>, %arg4: memref<1x8x128xf32, #tpu.memory_space<vmem>>) attributes {dimension_semantics = [#tpu.dimension_semantics<parallel>], iteration_bounds = array<i64: 2>, scalar_prefetch = 0 : i64, scratch_operands = 0 : i64, tpu.core_type = #tpu.core_type<tc>, window_params = [{transform_indices = @transform_0, window_bounds = array<i64: 16, 16>}, {pipeline_mode = #tpu.pipeline_mode<synchronous>, transform_indices = @transform_1, window_bounds = array<i64: 16, 128>}, {transform_indices = @transform_2, window_bounds = array<i64: 16, 128>}, {transform_indices = @transform_3, window_bounds = array<i64: 1, 8, 128>}]} {
    %c0 = arith.constant 0 : index
    %c0_0 = arith.constant 0 : index
    %0 = vector.load %arg1[%c0, %c0_0] : memref<16x16xf32, #tpu.memory_space<vmem>>, vector<16x16xf32>
    %c0_1 = arith.constant 0 : index
    %c0_2 = arith.constant 0 : index
    %1 = vector.load %arg3[%c0_1, %c0_2] : memref<16x128xbf16, #tpu.memory_space<vmem>>, vector<16x128xbf16>
    %2 = arith.extf %1 : vector<16x128xbf16> to vector<16x128xf32>
    %cst = arith.constant 0.000000e+00 : f32
    %3 = vector.broadcast %cst : f32 to vector<16x128xf32>
    %4 = arith.maximumf %2, %3 : vector<16x128xf32>
    %5 = arith.mulf %0, %0 : vector<16x16xf32>
    %cst_3 = arith.constant dense<0.000000e+00> : vector<16xf32>
    %6 = vector.multi_reduction <add>, %5, %cst_3 [1] : vector<16x16xf32> to vector<16xf32>
    %7 = vector.shape_cast %6 : vector<16xf32> to vector<16x1xf32>
    %cst_4 = arith.constant 1.000000e-24 : f32
    %8 = vector.broadcast %cst_4 : f32 to vector<16x1xf32>
    %9 = arith.maximumf %7, %8 : vector<16x1xf32>
    %10 = math.rsqrt %9 : vector<16x1xf32>
    %cst_5 = arith.constant 5.000000e+00 : f32
    %11 = vector.broadcast %cst_5 : f32 to vector<16x1xf32>
    %12 = arith.mulf %10, %11 : vector<16x1xf32>
    %13 = vector.broadcast %12 : vector<16x1xf32> to vector<16x16xf32>
    %14 = arith.mulf %0, %13 : vector<16x16xf32>
    %15 = arith.truncf %14 : vector<16x16xf32> to vector<16x16xbf16>
    %c0_6 = arith.constant 0 : index
    %c0_7 = arith.constant 0 : index
    %16 = vector.load %arg2[%c0_6, %c0_7] : memref<16x128xbf16, #tpu.memory_space<vmem>>, vector<16x128xbf16>
    %cst_8 = arith.constant dense<0.000000e+00> : vector<16x128xf32>
    %17 = tpu.matmul %15, %16, %cst_8 {dimension_numbers = #tpu.dot_dimension_numbers<[1], [0], [0], [1], [0, 0, 1, 1], [], []>} : vector<16x16xbf16>, vector<16x128xbf16>, vector<16x128xf32> -> vector<16x128xf32>
    %cst_9 = arith.constant dense<0xFF800000> : vector<16xf32>
    %18 = vector.multi_reduction <maximumf>, %17, %cst_9 [1] : vector<16x128xf32> to vector<16xf32>
    %19 = vector.shape_cast %18 : vector<16xf32> to vector<16x1xf32>
    %20 = vector.broadcast %19 : vector<16x1xf32> to vector<16x128xf32>
    %21 = arith.subf %17, %20 : vector<16x128xf32>
    %22 = math.exp %21 : vector<16x128xf32>
    %cst_10 = arith.constant 0.000000e+00 : f32
    %23 = vector.broadcast %cst_10 : f32 to vector<16x128xf32>
    %24 = arith.cmpf oeq, %2, %23 : vector<16x128xf32>
    %cst_11 = arith.constant 0.000000e+00 : f32
    %25 = vector.broadcast %cst_11 : f32 to vector<16x128xf32>
    %26 = arith.select %24, %22, %25 : vector<16x128xi1>, vector<16x128xf32>
    %cst_12 = arith.constant dense<0.000000e+00> : vector<16xf32>
    %27 = vector.multi_reduction <add>, %26, %cst_12 [1] : vector<16x128xf32> to vector<16xf32>
    %28 = vector.shape_cast %27 : vector<16xf32> to vector<16x1xf32>
    %29 = vector.broadcast %28 : vector<16x1xf32> to vector<16x128xf32>
    %30 = arith.addf %29, %22 : vector<16x128xf32>
    %cst_13 = arith.constant 1.000000e-10 : f32
    %31 = vector.broadcast %cst_13 : f32 to vector<16x128xf32>
    %32 = arith.addf %30, %31 : vector<16x128xf32>
    %33 = math.log %32 : vector<16x128xf32>
    %34 = arith.subf %21, %33 : vector<16x128xf32>
    %35 = arith.mulf %4, %34 : vector<16x128xf32>
    %36 = vector.shape_cast %35 : vector<16x128xf32> to vector<1x16x128xf32>
    %cst_14 = arith.constant dense<0.000000e+00> : vector<1xf32>
    %37 = vector.multi_reduction <add>, %36, %cst_14 [1, 2] : vector<1x16x128xf32> to vector<1xf32>
    %38 = vector.shape_cast %37 : vector<1xf32> to vector<1x1x1xf32>
    %39 = vector.extract %38[0, 0, 0] : f32 from vector<1x1x1xf32>
    %cst_15 = arith.constant 0.000000e+00 : f32
    %40 = arith.subf %cst_15, %39 : f32
    %41 = vector.broadcast %40 : f32 to vector<1x8x128xf32>
    %c0_16 = arith.constant 0 : index
    %c0_17 = arith.constant 0 : index
    %c0_18 = arith.constant 0 : index
    %42 = vector.load %arg4[%c0_16, %c0_17, %c0_18] : memref<1x8x128xf32, #tpu.memory_space<vmem>>, vector<1x8x128xf32>
    tpu.vector_store %arg4[%c0_16, %c0_17, %c0_18], %41 {strides = array<i32>} : memref<1x8x128xf32, #tpu.memory_space<vmem>>, vector<1x8x128xf32>,
    return
  }
  func.func @transform_0(%arg0: i32) -> (i32, i32) {
    %c0_i32 = arith.constant 0 : i32
    %c0_i32_0 = arith.constant 0 : i32
    return %arg0, %c0_i32 : i32, i32
  }
  func.func @transform_1(%arg0: i32) -> (i32, i32) {
    %c0_i32 = arith.constant 0 : i32
    %c0_i32_0 = arith.constant 0 : i32
    %c0_i32_1 = arith.constant 0 : i32
    return %c0_i32, %c0_i32_0 : i32, i32
  }
  func.func @transform_2(%arg0: i32) -> (i32, i32) {
    %c0_i32 = arith.constant 0 : i32
    %c0_i32_0 = arith.constant 0 : i32
    return %arg0, %c0_i32 : i32, i32
  }
  func.func @transform_3(%arg0: i32) -> (i32, i32, i32) {
    %c0_i32 = arith.constant 0 : i32
    %c0_i32_0 = arith.constant 0 : i32
    %c0_i32_1 = arith.constant 0 : i32
    return %arg0, %c0_i32, %c0_i32_0 : i32, i32, i32
  }
}

</mosaic_0001>

<bundles_post_ra>
// kernel: tpu_custom_call.1
= control target key start
LH: loop header
LB: loop body
LE: loop exit
PB: predicated region body
PF: predicated region fallthrough
CT: control target
= control target key end

     0   :  { %8 = vsyncpa [#allocation3], 0  ;;  %s673_s0 = inlined_call_operand.vmem [shape: f32[32,16], index: 0, kind: input, shape index: {}]   ;;  %s674_s1 = inlined_call_operand.vmem [shape: bf16[16,128], index: 1, kind: input, shape index: {}]   ;;  %s675_s2 = inlined_call_operand.vmem [shape: bf16[32,128], index: 2, kind: input, shape index: {}]   ;;  %s676_s3 = inlined_call_operand.hbm [shape: f32[2,8,128], index: 3, kind: output, shape index: {}]  }
   0x1   :  { %10 = vsyncpa [#allocation3 + $0x1], 0  ;;  %s568_s12 = smov 0   ;;  %s570_s13 = smov 0  }
   0x2   :  { %s572_s14 = smov 0   ;;  %s574_s15 = smov 0  }
   0x3 LB: > { %s589_s16 = sadd.s32 4294967295, %s543_s15   ;;  %s400_s17 = sadd.s32 4294967294, %s543_s15   ;;  %s543_s15 = sphi %s574_s15, %s682_s15   ;;  %s539_s14 = sphi %s572_s14, %s681_s14   ;;  %s535_s13 = sphi %s570_s13, %s680_s13   ;;  %s531_s12 = sphi %s568_s12, %s679_s12  }
   0x4   : > { %s593_s18 = sadd.s32 1, %s543_s15   ;;  %s96_s19 = sadd.s32 1, %s539_s14 }
   0x5   : > { %s93_s20 = ssub.s32 %s543_s15, %s593_s18  ;;  %p106_p0 = scmp.ne.s32.totalorder %s539_s14, %s535_s13 }
   0x6   : > { %p94_p1 = scmp.eq.s32.totalorder %s93_s20, 0  ;;  %p107_p2 = scmp.eq.s32.totalorder %s589_s16, 1 }
   0x7   : > { %p112_p3 = scmp.ne.s32.totalorder %s535_s13, %s531_s12  ;;  %p113_p4 = scmp.eq.s32.totalorder %s400_s17, 1 }
   0x8   : > { %s604_s21 = scalar_select %p94_p1, %s539_s14, %s96_s19  }
   0x9   : > { %p606_p5 = por %p107_p2, %p106_p0  ;;  %p610_p6 = por %p113_p4, %p112_p3 }
   0xa   : > { %p403_p7 = scmp.ge.s32.totalorder %s543_s15, 1  ;;  %p152_p8 = scmp.lt.s32.totalorder %s543_s15, 3 }
   0xc   : > { %p153_p9 = pnand %p403_p7, %p152_p8 }
   0xd   : > { %s405_s24 = sshll.u32 (!%p153_p9), %s589_s16, 1  ;;  %s178_s8 = sand.u32 (!%p153_p9), 1, %s535_s13  }
   0xe   : > { %156 = sbr.rel (%p153_p9) target bundleno = 924 (0x39c), region = 32  ;;  %p182_p10 = scmp.lt.s32.totalorder (!%p153_p9), %s405_s24, 3 }
   0xf   : > { %s404_s9 = sshll.u32 (!%p153_p9), %s178_s8, 3  ;;  %s412_s17 = sshll.u32 (!%p153_p9), %s589_s16, 7 }
  0x10   : > { %s180_s10 = scalar_lea.vmem (!%p153_p9), [#allocation2], %s404_s9  ;;  %s638_s26 = scalar_lea.hbm (!%p153_p9), %s676_s3, %s412_s17 }
  0x11   : > { %s329_s11 = sshll.u32 (!%p153_p9), %s180_s10, 4  ;;  %s316_s27 = scalar_lea.sflag (!%p153_p9), [#allocation3], %s178_s8  ;;  %s330_s11 = int_to_ptr.vmem [resolvable:$true] %s329_s11 }
  0x12   : > { %s547_s29 = smov (!%p153_p9), [#allocation2]  }
  0x13   : > { %s684_s24 = smov (!%p182_p10, %s405_s24), 3  ;;  %vm204_vm0 = vcmask 130048   ;;  %v470_v6 = vld [vmem:[%s674_s1] sm:$0xff]   ;;  %v545_v7 = vmov 0.0   ;;  %vm546_vm1 = vmmov 0   ;;  %s487_s30 = sshll.u32 %s547_s29, 4  ;;  %s488_s30 = int_to_ptr.vmem [resolvable:$false] %s487_s30 }
  0x14   : > { %s406_s25 = sshll.u32 %s684_s24, 3  ;;  %421 = vmatprep.subr.bf16.mxu0 %v545_v7  ;;  %423 = vmatprep.mubr.msk.bf16.mxu0 %vm546_vm1, %v545_v7  ;;  %s408_s4 = sshll.u32 %s684_s24, 2 }
  0x15   : > { %s185_s28 = scalar_lea.vmem %s673_s0, %s406_s25  ;;  %422 = vmatpush3.bf16.msra.mxu0 %v470_v6  ;;  %s191_s7 = scalar_lea.vmem %s675_s2, %s408_s4 }
  0x16   : > { %v194_v0 = vld [vmem:[%s185_s28] sm:$0xff]  ;;  %v195_v1 = vld [vmem:[%s185_s28 + $0x8] sm:$0xff]  ;;  %s483_s28 = scalar_lea.vmem %s330_s11, 128  ;;  %s489_s16 = scalar_lea.vmem %s488_s30, 256 }
  0x17   : > { %v202_v2 = vmul.f32 %v194_v0, %v194_v0  ;;  %v203_v3 = vmul.f32 %v195_v1, %v195_v1  ;;  %v416_v29 = vld [vmem:[%s191_s7] sm:$0xff]   ;;  %p484_p11 = scmp.ne.s32.totalorder %s330_s11, %s483_s28  ;;  %p490_p0 = scmp.lt.s32.totalorder %s330_s11, %s488_s30 }
  0x18   : > { %v417_v30 = vunpack.c.l.bf16 %v416_v29  ;;  %v418_v31 = vunpack.c.h.bf16 %v416_v29  ;;  %p491_p1 = scmp.lt.s32.totalorder %s489_s16, %s483_s28 }
  0x19   : > { %v205_v4 = vsel %vm204_vm0, %v202_v2, 0.0  ;;  %v208_v5 = vsel %vm204_vm0, %v203_v3, 0.0  ;;  %p485_p12 = pnand %p484_p11, %p606_p5 }
  0x1a   : > { %206 = vadd.xlane.f32.xlu0 %v205_v4  ;;  %vm282_vm2 = vcmp.eq.f32.partialorder %v417_v30, 0.0  ;;  %vm283_vm3 = vcmp.eq.f32.partialorder %v418_v31, 0.0  ;;  %v200_v46 = vmax.f32 %v417_v30, 0.0  ;;  %v201_v47 = vmax.f32 %v418_v31, 0.0  ;;  %p492_p2 = por %p491_p1, %p490_p0 }
  0x1b   : > { %p486_p13 = pneg %p485_p12 }
  0x1d   : > { %p493_p3 = pnand %p492_p2, %p486_p13 }
  0x1e   : > { %209 = vadd.xlane.f32.xlu0 %v208_v5 }
  0xa3   : > { %v207_v8 = vpop.xlane.xlu0 %206 }
  0xa4   : > { %v211_v9 = vmax.f32 %v207_v8, 1e-24 }
  0xa6   : > { %471 = vrsqrt.f32 %v211_v9 }
  0xa7   : > { %v210_v10 = vpop.xlane.xlu0 %209 }
  0xa8   : > { %v212_v11 = vmax.f32 %v210_v10, 1e-24 }
  0xaa   : > { %473 = vrsqrt.f32 %v212_v11 }
  0xb3   : > { %v472_v12 = vpop.eup %471 }
  0xb4   : > { %v215_v13 = vmul.f32 5.0, %v472_v12 }
  0xb6   : > { %v217_v16 = vmul.f32 %v215_v13, %v194_v0 }
  0xb7   : > { %v474_v14 = vpop.eup %473 }
  0xb8   : > { %v216_v15 = vmul.f32 5.0, %v474_v14 }
  0xba   : > { %v218_v17 = vmul.f32 %v216_v15, %v195_v1 }
  0xbc   : > { %v219_v18 = vpack.c.bf16 %v218_v17, %v217_v16 }
  0xbe   : > { %424 = vmatmul.mubr.msk.bf16.vlgmr.msra.gmra.mxu0 %vm204_vm0, %v219_v18 }
 0x17e   : > { %v265_v19 = vpop.f32.mrf.mxu0 }
 0x17f   : > { %272 = vmax.xlane.f32.xlu1 %v265_v19 }
 0x180   : > { %v425_v20 = vpop.f32.mrf.mxu0 }
 0x182   : > { %v268_v21 = vpop.f32.mrf.mxu0 }
 0x183   : > { %274 = vmax.xlane.f32.xlu1 %v268_v21 }
 0x184   : > { %v426_v22 = vpop.f32.mrf.mxu0 }
 0x208   : > { %v273_v23 = vpop.xlane.xlu1 %272 }
 0x209   : > { %v276_v24 = vsub.f32 %v265_v19, %v273_v23 }
 0x20b   : > { %v278_v25 = vmul.f32 1.442695, %v276_v24 }
 0x20c   : > { %v275_v26 = vpop.xlane.xlu1 %274 }
 0x20d   : > { %475 = vpow2.f32 %v278_v25  ;;  %v277_v27 = vsub.f32 %v268_v21, %v275_v26 }
 0x20f   : > { %v280_v28 = vmul.f32 1.442695, %v277_v27 }
 0x211   : > { %477 = vpow2.f32 %v280_v28 }
 0x21a   : > { %v476_v32 = vpop.eup %475 }
 0x21b   : > { %v284_v33 = vsel %vm282_vm2, %v476_v32, 0.0 }
 0x21c   : > { %286 = vadd.xlane.f32.xlu0 %v284_v33 }
 0x21e   : > { %v478_v34 = vpop.eup %477 }
 0x21f   : > { %v285_v35 = vsel %vm283_vm3, %v478_v34, 0.0 }
 0x220   : > { %288 = vadd.xlane.f32.xlu1 %v285_v35 }
 0x2a5   : > { %v287_v36 = vpop.xlane.xlu0 %286 }
 0x2a6   : > { %v290_v37 = vadd.f32 %v476_v32, %v287_v36 }
 0x2a8   : > { %v292_v38 = vadd.f32 1e-10, %v290_v37 }
 0x2a9   : > { %v289_v39 = vpop.xlane.xlu1 %288 }
 0x2aa   : > { %479 = vlog2.f32 %v292_v38  ;;  %v291_v40 = vadd.f32 %v478_v34, %v289_v39 }
 0x2ac   : > { %v293_v41 = vadd.f32 1e-10, %v291_v40 }
 0x2ae   : > { %481 = vlog2.f32 %v293_v41 }
 0x2b7   : > { %v480_v42 = vpop.eup %479 }
 0x2b8   : > { %v295_v43 = vmul.f32 0.6931472, %v480_v42 }
 0x2ba   : > { %v298_v48 = vsub.f32 %v276_v24, %v295_v43 }
 0x2bb   : > { %v482_v44 = vpop.eup %481 }
 0x2bc   : > { %v297_v45 = vmul.f32 0.6931472, %v482_v44  ;;  %v300_v50 = vmul.f32 %v298_v48, %v200_v46 }
 0x2be   : > { %v299_v49 = vsub.f32 %v277_v27, %v297_v45 }
 0x2c0   : > { %v301_v51 = vmul.f32 %v299_v49, %v201_v47 }
 0x2c2   : > { %v302_v52 = vadd.f32 %v301_v51, %v300_v50 }
 0x2c4   : > { %303 = vadd.xlane.f32.xlu0 %v302_v52 }
 0x34d   : > { %v304_v53 = vpop.xlane.xlu0 %303 }
 0x34e   : > { %v305_v54 = vrot.slane %v304_v53, 4 }
 0x350   : > { %v306_v55 = vadd.f32 %v305_v54, %v304_v53 }
 0x352   : > { %v307_v56 = vrot.slane %v306_v55, 2 }
 0x354   : > { %v308_v57 = vadd.f32 %v307_v56, %v306_v55 }
 0x356   : > { %v309_v58 = vrot.slane %v308_v57, 1 }
 0x358   : > { %v310_v59 = vadd.f32 %v309_v58, %v308_v57 }
 0x35a   : > { %427 = vpush %v310_v59 }
 0x38b   : > { %s428_s19 = spop %427 }
 0x38c   : > { %s312_s20 = ssub.f32 0.0, %s428_s19 }
 0x38e   : > { %v313_v60 = vstv %s312_s20 }
 0x38f   : > { %314 = vst [vmem:[%s180_s10] sm:$0xff] %v313_v60 }
 0x390   : > { %496 = shalt.err (!%p493_p3)
}
 0x391   : > { %s497_s4 = scalar_lea.hbm %s638_s26, 128  ;;  %s501_s7 = scalar_lea.hbm %s676_s3, 256 }
 0x392   : > { %p498_p4 = scmp.ne.s32.totalorder %s638_s26, %s497_s4  ;;  %p502_p9 = scmp.lt.s32.totalorder %s638_s26, %s676_s3 }
 0x393   : > { %p503_p10 = scmp.lt.s32.totalorder %s501_s7, %s497_s4 }
 0x394   : > { %p499_p7 = pnand %p498_p4, %p606_p5 }
 0x395   : > { %p504_p11 = por %p503_p10, %p502_p9 }
 0x396   : > { %p500_p8 = pneg %p499_p7 }
 0x398   : > { %p505_p12 = pnand %p504_p11, %p500_p8 }
 0x39a   : > { %508 = shalt.err (!%p505_p12)
}
 0x39b   : > { %429 = dma.vmem_to_hbm [thread:$0]  (%p606_p5), %s330_s11, 128, %s638_s26, %s316_s27  }
 0x39c PF: > { %p435_p13 = scmp.ge.s32.totalorder %s543_s15, 2  ;;  %s341_s10 = sand.u32 1, %s531_s12  }
 0x39d   : > { %s342_s17 = scalar_lea.sflag [#allocation3], %s341_s10 }
 0x39e   : > { %p432_p0 = pnand %p435_p13, %p610_p6 }
 0x3a0   : > { %p433_p1 = pneg %p432_p0 }
 0x3a2   : > { %526 = dma.done.wait (%p433_p1), %s342_s17, 128  }
 0x3a3   : > { %528 = vsyncadd (%p433_p1), %s342_s17, 4294967168  ;;  %p13_p2 = scmp.ge.s32.totalorder %s593_s18, 4   ;;  %s679_s12 = smov %s535_s13 }
 0x3a4   : > { %s680_s13 = smov %s539_s14  ;;  %s681_s14 = smov %s604_s21 }
 0x3a5   : > { %s682_s15 = smov %s593_s18  ;;  %15 = sbr.rel (!%p13_p2) target bundleno = 3 (0x3), region = 70 }
 0x3aa   :  { %347 = vsyncpa [#allocation3], 1 }
 0x3ab   :  { %349 = vsyncpa [#allocation3 + $0x1], 1 }

</bundles_post_ra>
